<compile_context>
chip_gen: v7x
topology: tpu7x:2x2x1
jax: 0.10.0
libtpu: 0.0.40
codegen_flags: <defaults>
</compile_context>

<pallas_src>
import numpy as np
import jax
import jax.numpy as jnp
from jax import lax
from jax.experimental import pallas as pl
from jax.experimental.pallas import tpu as pltpu


_INV_SQRT2 = 0.7071067811865476


def _erf_poly(x):
    # Abramowitz & Stegun 7.1.26 (max abs err ~1.5e-7).
    # TODO(synk): lax.erf has no guaranteed Mosaic lowering; the polynomial
    # keeps us within ~1e-6 of torch's exact erf-GELU.
    a1, a2, a3, a4, a5 = 0.254829592, -0.284496736, 1.421413741, -1.453152027, 1.061405429
    p = 0.3275911
    ax = jnp.abs(x)
    t = 1.0 / (1.0 + p * ax)
    poly = ((((a5 * t + a4) * t + a3) * t + a2) * t + a1) * t
    y = 1.0 - poly * jnp.exp(-ax * ax)
    return jnp.where(x >= 0, y, -y)


def _gelu_exact(x):
    # Matches torch nn.GELU() default (erf-based). _gelu_exact(0) == 0 exactly,
    # which the block-diagonal expand trick below relies on.
    return 0.5 * x * (1.0 + _erf_poly(x * _INV_SQRT2))


# ------------- kernel A: contract (reduce over T) + GELU + per-expert expand -------------

def _contract_expand_kernel(dm_ref, sw1_ref, b1_ref, w2_ref, b2_ref, y_ref, dsum_ref):
    t = pl.program_id(1)

    @pl.when(t == 0)
    def _():
        dsum_ref[...] = jnp.zeros_like(dsum_ref)

    # dm_ref[0]: (tT, E*C) = dispatch_mask * sum_d x ; reduce this token tile.
    dsum_ref[...] += jnp.sum(dm_ref[0], axis=0, keepdims=True)          # (1, E*C)

    @pl.when(t == pl.num_programs(1) - 1)
    def _():
        # h laid out (E*O1, E*C): row-broadcast of dsum against block-diagonal
        # weights (off-block entries are exactly 0, GELU(0) == 0).
        h = dsum_ref[...] * sw1_ref[...] + b1_ref[...]                  # (E*O1, E*C)
        a = _gelu_exact(h)
        # One trans-A matmul performs the expand for all experts at once.
        y = lax.dot_general(a, w2_ref[...],
                            (((0,), (0,)), ((), ())),
                            preferred_element_type=jnp.float32)         # (E*C, D_out)
        y_ref[0] = y + b2_ref[...]


# ------------- kernel B: combine   out[b,t,:] = cm[b,t,:] @ y[b] -------------

def _combine_kernel(cm_ref, y_ref, out_ref):
    out_ref[0] = jnp.dot(cm_ref[0], y_ref[0],
                         preferred_element_type=jnp.float32).astype(out_ref.dtype)


# ------------------------------ wrapper ------------------------------

def _pick_t_tile(T, max_tile=512):
    if T <= max_tile:
        return T
    for t in range(max_tile, 7, -8):
        if T % t == 0:
            return t
    return T          # fall back to one full-T block (always legal)


def _pad_to(n, m):
    return ((n + m - 1) // m) * m


def _tile_bytes(rows, cols, itemsize=4):
    # one f32 VMEM tile with (8,128) sublane/lane padding
    return _pad_to(max(int(rows), 1), 8) * _pad_to(max(int(cols), 1), 128) * itemsize


def _vmem_limit_bytes(needed):
    try:
        cap = int(pltpu.get_tpu_info().vmem_capacity_bytes)
    except Exception:
        cap = 64 * 1024 * 1024          # conservative (v7x-sized) fallback
    ceiling = (cap * 3) // 4            # leave headroom for Mosaic internal scratch
    want = max(2 * int(needed), 32 * 1024 * 1024)
    return int(min(want, ceiling))


def experts_choose_masked_mlp(x, combine_array, dispatch_mask, w1, b1, w2, b2,
                              num_experts):
    B, T, D_in = x.shape
    E = num_experts
    C = combine_array.shape[-1]
    H = w1.shape[0]
    D_out = w2.shape[0]
    O1 = H // E                  # expert hidden width
    EC = E * C
    EO = E * O1
    f32 = jnp.float32

    # einsum quirk: only the row sums of x and W1 enter the contract. Fold the
    # x row-sum straight into the dispatch mask and flatten (E, C) -> E*C
    # (free reshape => lane-dense DMA, no XLA transpose pre-pass).
    sx = jnp.sum(x.astype(f32), axis=-1)                                  # (B, T)
    dm_scaled = (dispatch_mask.astype(f32) * sx[..., None, None]).reshape(B, T, EC)
    cm_flat = combine_array.astype(f32).reshape(B, T, EC)

    sw1 = jnp.sum(w1.astype(f32).reshape(E, O1, D_in), axis=-1)           # (E, O1)
    b1r = b1.astype(f32).reshape(E, O1)

    # Block-diagonal broadcast over (expert_out, expert_capacity) so the whole
    # per-expert expand becomes a single trans-A matmul inside the kernel.
    # TODO(synk): for very large E*O1 / E*C, fall back to a per-expert loop (or
    # bf16 weights / resident expert groups) to keep these operands in VMEM.
    eye = jnp.eye(E, dtype=f32)

    def _blockdiag(m):                                                    # (E,O1)->(E*O1, E*C)
        blk = m[:, :, None, None] * eye[:, None, :, None]                 # (E,O1,E,1)
        blk = jnp.broadcast_to(blk, (E, O1, E, C))
        return blk.reshape(EO, EC)

    sw1_blk = _blockdiag(sw1)
    b1_blk = _blockdiag(b1r)
    w2big = jnp.transpose(w2.astype(f32).reshape(E, D_out, O1), (0, 2, 1)).reshape(EO, D_out)
    b2r = b2.astype(f32).reshape(1, D_out)

    tT = _pick_t_tile(T)
    nT = T // tT

    # ---- VMEM budgets (double-buffered, (8,128)-padded) ----
    vmem_a = (2 * _tile_bytes(tT, EC)                   # dm tile
              + 2 * (2 * _tile_bytes(EO, EC)            # sw1_blk, b1_blk (resident)
                     + _tile_bytes(EO, D_out)           # w2big (resident)
                     + _tile_bytes(1, D_out))           # b2 (resident)
              + 2 * _tile_bytes(EC, D_out)              # y output block
              + _tile_bytes(1, EC))                     # dsum scratch
    vmem_b = (2 * _tile_bytes(tT, EC)
              + 2 * _tile_bytes(EC, D_out)
              + 2 * _tile_bytes(tT, D_out))

    # ---- kernel A: per-batch expert outputs y[b] of shape (E*C, D_out) ----
    y = pl.pallas_call(
        _contract_expand_kernel,
        out_shape=jax.ShapeDtypeStruct((B, EC, D_out), f32),
        grid_spec=pltpu.PrefetchScalarGridSpec(
            num_scalar_prefetch=0,
            grid=(B, nT),
            in_specs=[
                pl.BlockSpec((1, tT, EC), lambda b, t: (b, t, 0)),        # dm_scaled
                pl.BlockSpec((EO, EC), lambda b, t: (0, 0)),              # sw1_blk (resident)
                pl.BlockSpec((EO, EC), lambda b, t: (0, 0)),              # b1_blk  (resident)
                pl.BlockSpec((EO, D_out), lambda b, t: (0, 0)),           # w2big   (resident)
                pl.BlockSpec((1, D_out), lambda b, t: (0, 0)),            # b2      (resident)
            ],
            out_specs=pl.BlockSpec((1, EC, D_out), lambda b, t: (b, 0, 0)),
            scratch_shapes=[pltpu.VMEM((1, EC), f32)],
        ),
        compiler_params=pltpu.CompilerParams(
            dimension_semantics=("parallel", "arbitrary"),
            vmem_limit_bytes=_vmem_limit_bytes(vmem_a)),
    )(dm_scaled, sw1_blk, b1_blk, w2big, b2r)

    # ---- kernel B: combine back to tokens, one lane-dense matmul per tile ----
    out = pl.pallas_call(
        _combine_kernel,
        out_shape=jax.ShapeDtypeStruct((B, T, D_out), f32),
        grid_spec=pltpu.PrefetchScalarGridSpec(
            num_scalar_prefetch=0,
            grid=(B, nT),
            in_specs=[
                pl.BlockSpec((1, tT, EC), lambda b, t: (b, t, 0)),        # combine weights
                pl.BlockSpec((1, EC, D_out), lambda b, t: (b, 0, 0)),     # y[b] (resident per b)
            ],
            out_specs=pl.BlockSpec((1, tT, D_out), lambda b, t: (b, t, 0)),
        ),
        compiler_params=pltpu.CompilerParams(
            dimension_semantics=("parallel", "parallel"),
            vmem_limit_bytes=_vmem_limit_bytes(vmem_b)),
    )(cm_flat, y)
    return out


def reference_forward(x, combine_array, dispatch_mask, w1, b1, w2, b2, num_experts):
    """Pure-JAX mirror of the torch module (einsum-for-einsum)."""
    E = num_experts
    H = w1.shape[0]
    D_out = w2.shape[0]
    O1 = H // E

    # --- ExpertsChooseMaskedContract ---
    w1r = w1.reshape(E, O1, -1)
    b1r = b1.reshape(E, O1)
    # torch.einsum('bt...,btec,eoi->beco'): d, t and i are summed out.
    h = jnp.einsum('btd,btec,eoi->beco', x, dispatch_mask, w1r)
    h = h + b1r[None, :, None, :]

    # --- activation (torch nn.GELU() default = exact erf GELU) ---
    a = jax.nn.gelu(h, approximate=False)

    # --- ExpertsChooseMaskedExpand (bias path) ---
    w2r = w2.reshape(E, D_out, O1)
    a_homo = jnp.concatenate([a, jnp.ones_like(a[..., :1])], axis=-1)
    b2e = jnp.broadcast_to(b2.reshape(1, -1)[..., None], (E, D_out, 1))
    w_homo = jnp.concatenate([w2r, b2e], axis=-1)
    return jnp.einsum('beci,eoi,btec->bto', a_homo, w_homo, combine_array)


if __name__ == "__main__":
    key = jax.random.PRNGKey(0)
    B, T, D_in, E, C = 2, 16, 64, 4, 8
    mlp_ratio = 0.5
    D_out = D_in
    H = int(D_out * mlp_ratio)  # hidden features = 32

    ks = jax.random.split(key, 7)
    x = jax.random.normal(ks[0], (B, T, D_in), jnp.float32)
    combine_array = jax.random.uniform(ks[1], (B, T, E, C), jnp.float32)
    dispatch_mask = (jax.random.uniform(ks[2], (B, T, E, C)) > 0.5).astype(jnp.float32)

    # Deterministic nn.Linear-style init (uniform +/- 1/sqrt(fan_in)).
    w1 = jax.random.uniform(ks[3], (H, D_in), jnp.float32, -1.0, 1.0) / np.sqrt(D_in)
    b1 = jax.random.uniform(ks[4], (H,), jnp.float32, -1.0, 1.0) / np.sqrt(D_in)
    w2 = jax.random.uniform(ks[5], (D_out, H), jnp.float32, -1.0, 1.0) / np.sqrt(H)
    b2 = jax.random.uniform(ks[6], (D_out,), jnp.float32, -1.0, 1.0) / np.sqrt(H)

    out = experts_choose_masked_mlp(x, combine_array, dispatch_mask,
                                    w1, b1, w2, b2, E)
    out = jax.block_until_ready(out)

    ref = reference_forward(x, combine_array, dispatch_mask, w1, b1, w2, b2, E)
    assert out.shape == (B, T, D_out), out.shape
    max_err = float(jnp.max(jnp.abs(out - ref)))
    assert jnp.allclose(out, ref, rtol=1e-4, atol=1e-4), f"max_err={max_err}"
    print("KERNEL_OK")
</pallas_src>

<mosaic_0001>
module attributes {stable_mosaic.version = 11 : i64} {
  func.func @_contract_expand_kernel(%arg0: i32, %arg1: i32, %arg2: memref<1x16x32xf32, #tpu.memory_space<vmem>>, %arg3: memref<32x32xf32, #tpu.memory_space<vmem>>, %arg4: memref<32x32xf32, #tpu.memory_space<vmem>>, %arg5: memref<32x64xf32, #tpu.memory_space<vmem>>, %arg6: memref<1x64xf32, #tpu.memory_space<vmem>>, %arg7: memref<1x32x64xf32, #tpu.memory_space<vmem>>, %arg8: memref<1x32xf32, #tpu.memory_space<vmem>>) attributes {dimension_semantics = [#tpu.dimension_semantics<parallel>, #tpu.dimension_semantics<arbitrary>], iteration_bounds = array<i64: 2, 1>, scalar_prefetch = 0 : i64, scratch_operands = 1 : i64, tpu.core_type = #tpu.core_type<tc>, window_params = [{transform_indices = @transform_0, window_bounds = array<i64: 1, 16, 32>}, {pipeline_mode = #tpu.pipeline_mode<synchronous>, transform_indices = @transform_1, window_bounds = array<i64: 32, 32>}, {pipeline_mode = #tpu.pipeline_mode<synchronous>, transform_indices = @transform_2, window_bounds = array<i64: 32, 32>}, {pipeline_mode = #tpu.pipeline_mode<synchronous>, transform_indices = @transform_3, window_bounds = array<i64: 32, 64>}, {pipeline_mode = #tpu.pipeline_mode<synchronous>, transform_indices = @transform_4, window_bounds = array<i64: 1, 64>}, {transform_indices = @transform_5, window_bounds = array<i64: 1, 32, 64>}]} {
    %c0_i32 = arith.constant 0 : i32
    %0 = arith.cmpi eq, %arg1, %c0_i32 : i32
    %1 = arith.extui %0 : i1 to i32
    %c0_i32_0 = arith.constant 0 : i32
    %2 = arith.cmpi ne, %1, %c0_i32_0 : i32
    scf.if %2 {
      %cst_9 = arith.constant 0.000000e+00 : f32
      %13 = vector.broadcast %cst_9 : f32 to vector<1x32xf32>
      %c0_10 = arith.constant 0 : index
      %c0_11 = arith.constant 0 : index
      %14 = vector.load %arg8[%c0_10, %c0_11] : memref<1x32xf32, #tpu.memory_space<vmem>>, vector<1x32xf32>
      tpu.vector_store %arg8[%c0_10, %c0_11], %13 {strides = array<i32>} : memref<1x32xf32, #tpu.memory_space<vmem>>, vector<1x32xf32>,
    } else {
    }
    %c0 = arith.constant 0 : index
    %c0_1 = arith.constant 0 : index
    %3 = vector.load %arg8[%c0, %c0_1] : memref<1x32xf32, #tpu.memory_space<vmem>>, vector<1x32xf32>
    %c0_2 = arith.constant 0 : index
    %c0_3 = arith.constant 0 : index
    %c0_4 = arith.constant 0 : index
    %4 = vector.load %arg2[%c0_2, %c0_3, %c0_4] : memref<1x16x32xf32, #tpu.memory_space<vmem>>, vector<1x16x32xf32>
    %5 = vector.shape_cast %4 : vector<1x16x32xf32> to vector<16x32xf32>
    %cst = arith.constant dense<0.000000e+00> : vector<32xf32>
    %6 = vector.multi_reduction <add>, %5, %cst [0] : vector<16x32xf32> to vector<32xf32>
    %7 = vector.shape_cast %6 : vector<32xf32> to vector<1x32xf32>
    %8 = arith.addf %3, %7 : vector<1x32xf32>
    %c0_5 = arith.constant 0 : index
    %c0_6 = arith.constant 0 : index
    %9 = vector.load %arg8[%c0_5, %c0_6] : memref<1x32xf32, #tpu.memory_space<vmem>>, vector<1x32xf32>
    tpu.vector_store %arg8[%c0_5, %c0_6], %8 {strides = array<i32>} : memref<1x32xf32, #tpu.memory_space<vmem>>, vector<1x32xf32>,
    %c0_i32_7 = arith.constant 0 : i32
    %10 = arith.cmpi eq, %arg1, %c0_i32_7 : i32
    %11 = arith.extui %10 : i1 to i32
    %c0_i32_8 = arith.constant 0 : i32
    %12 = arith.cmpi ne, %11, %c0_i32_8 : i32
    scf.if %12 {
      %c0_9 = arith.constant 0 : index
      %c0_10 = arith.constant 0 : index
      %13 = vector.load %arg8[%c0_9, %c0_10] : memref<1x32xf32, #tpu.memory_space<vmem>>, vector<1x32xf32>
      %c0_11 = arith.constant 0 : index
      %c0_12 = arith.constant 0 : index
      %14 = vector.load %arg3[%c0_11, %c0_12] : memref<32x32xf32, #tpu.memory_space<vmem>>, vector<32x32xf32>
      %15 = vector.broadcast %13 : vector<1x32xf32> to vector<32x32xf32>
      %16 = arith.mulf %15, %14 : vector<32x32xf32>
      %c0_13 = arith.constant 0 : index
      %c0_14 = arith.constant 0 : index
      %17 = vector.load %arg4[%c0_13, %c0_14] : memref<32x32xf32, #tpu.memory_space<vmem>>, vector<32x32xf32>
      %18 = arith.addf %16, %17 : vector<32x32xf32>
      %cst_15 = arith.constant 5.000000e-01 : f32
      %19 = vector.broadcast %cst_15 : f32 to vector<32x32xf32>
      %20 = arith.mulf %19, %18 : vector<32x32xf32>
      %cst_16 = arith.constant 0.707106769 : f32
      %21 = vector.broadcast %cst_16 : f32 to vector<32x32xf32>
      %22 = arith.mulf %18, %21 : vector<32x32xf32>
      %23 = math.absf %22 : vector<32x32xf32>
      %cst_17 = arith.constant 0.327591091 : f32
      %24 = vector.broadcast %cst_17 : f32 to vector<32x32xf32>
      %25 = arith.mulf %24, %23 : vector<32x32xf32>
      %cst_18 = arith.constant 1.000000e+00 : f32
      %26 = vector.broadcast %cst_18 : f32 to vector<32x32xf32>
      %27 = arith.addf %26, %25 : vector<32x32xf32>
      %cst_19 = arith.constant 1.000000e+00 : f32
      %28 = vector.broadcast %cst_19 : f32 to vector<32x32xf32>
      %29 = arith.divf %28, %27 : vector<32x32xf32>
      %cst_20 = arith.constant 1.06140542 : f32
      %30 = vector.broadcast %cst_20 : f32 to vector<32x32xf32>
      %31 = arith.mulf %30, %29 : vector<32x32xf32>
      %cst_21 = arith.constant -1.45315206 : f32
      %32 = vector.broadcast %cst_21 : f32 to vector<32x32xf32>
      %33 = arith.addf %31, %32 : vector<32x32xf32>
      %34 = arith.mulf %33, %29 : vector<32x32xf32>
      %cst_22 = arith.constant 1.42141378 : f32
      %35 = vector.broadcast %cst_22 : f32 to vector<32x32xf32>
      %36 = arith.addf %34, %35 : vector<32x32xf32>
      %37 = arith.mulf %36, %29 : vector<32x32xf32>
      %cst_23 = arith.constant -0.284496725 : f32
      %38 = vector.broadcast %cst_23 : f32 to vector<32x32xf32>
      %39 = arith.addf %37, %38 : vector<32x32xf32>
      %40 = arith.mulf %39, %29 : vector<32x32xf32>
      %cst_24 = arith.constant 0.254829586 : f32
      %41 = vector.broadcast %cst_24 : f32 to vector<32x32xf32>
      %42 = arith.addf %40, %41 : vector<32x32xf32>
      %43 = arith.mulf %42, %29 : vector<32x32xf32>
      %cst_25 = arith.constant 0.000000e+00 : f32
      %44 = vector.broadcast %cst_25 : f32 to vector<32x32xf32>
      %45 = arith.subf %44, %23 : vector<32x32xf32>
      %46 = arith.mulf %45, %23 : vector<32x32xf32>
      %47 = math.exp %46 : vector<32x32xf32>
      %48 = arith.mulf %43, %47 : vector<32x32xf32>
      %cst_26 = arith.constant 1.000000e+00 : f32
      %49 = vector.broadcast %cst_26 : f32 to vector<32x32xf32>
      %50 = arith.subf %49, %48 : vector<32x32xf32>
      %cst_27 = arith.constant 0.000000e+00 : f32
      %51 = vector.broadcast %cst_27 : f32 to vector<32x32xf32>
      %52 = arith.cmpf oge, %22, %51 : vector<32x32xf32>
      %cst_28 = arith.constant 0.000000e+00 : f32
      %53 = vector.broadcast %cst_28 : f32 to vector<32x32xf32>
      %54 = arith.subf %53, %50 : vector<32x32xf32>
      %55 = arith.select %52, %50, %54 : vector<32x32xi1>, vector<32x32xf32>
      %cst_29 = arith.constant 1.000000e+00 : f32
      %56 = vector.broadcast %cst_29 : f32 to vector<32x32xf32>
      %57 = arith.addf %56, %55 : vector<32x32xf32>
      %58 = arith.mulf %20, %57 : vector<32x32xf32>
      %c0_30 = arith.constant 0 : index
      %c0_31 = arith.constant 0 : index
      %59 = vector.load %arg5[%c0_30, %c0_31] : memref<32x64xf32, #tpu.memory_space<vmem>>, vector<32x64xf32>
      %cst_32 = arith.constant dense<0.000000e+00> : vector<32x64xf32>
      %60 = tpu.matmul %58, %59, %cst_32 {dimension_numbers = #tpu.dot_dimension_numbers<[0], [0], [1], [1], [0, 1, 1, 1], [], []>} : vector<32x32xf32>, vector<32x64xf32>, vector<32x64xf32> -> vector<32x64xf32>
      %c0_33 = arith.constant 0 : index
      %c0_34 = arith.constant 0 : index
      %61 = vector.load %arg6[%c0_33, %c0_34] : memref<1x64xf32, #tpu.memory_space<vmem>>, vector<1x64xf32>
      %62 = vector.broadcast %61 : vector<1x64xf32> to vector<32x64xf32>
      %63 = arith.addf %60, %62 : vector<32x64xf32>
      %c0_35 = arith.constant 0 : index
      %c0_36 = arith.constant 0 : index
      %c0_37 = arith.constant 0 : index
      %64 = vector.load %arg7[%c0_35, %c0_36, %c0_37] : memref<1x32x64xf32, #tpu.memory_space<vmem>>, vector<1x32x64xf32>
      %65 = vector.shape_cast %64 : vector<1x32x64xf32> to vector<32x64xf32>
      %66 = vector.shape_cast %63 : vector<32x64xf32> to vector<1x32x64xf32>
      tpu.vector_store %arg7[%c0_35, %c0_36, %c0_37], %66 {strides = array<i32>} : memref<1x32x64xf32, #tpu.memory_space<vmem>>, vector<1x32x64xf32>,
    } else {
    }
    return
  }
  func.func @transform_0(%arg0: i32, %arg1: i32) -> (i32, i32, i32) {
    %c0_i32 = arith.constant 0 : i32
    %c0_i32_0 = arith.constant 0 : i32
    return %arg0, %arg1, %c0_i32 : i32, i32, i32
  }
  func.func @transform_1(%arg0: i32, %arg1: i32) -> (i32, i32) {
    %c0_i32 = arith.constant 0 : i32
    %c0_i32_0 = arith.constant 0 : i32
    %c0_i32_1 = arith.constant 0 : i32
    return %c0_i32, %c0_i32_0 : i32, i32
  }
  func.func @transform_2(%arg0: i32, %arg1: i32) -> (i32, i32) {
    %c0_i32 = arith.constant 0 : i32
    %c0_i32_0 = arith.constant 0 : i32
    %c0_i32_1 = arith.constant 0 : i32
    return %c0_i32, %c0_i32_0 : i32, i32
  }
  func.func @transform_3(%arg0: i32, %arg1: i32) -> (i32, i32) {
    %c0_i32 = arith.constant 0 : i32
    %c0_i32_0 = arith.constant 0 : i32
    %c0_i32_1 = arith.constant 0 : i32
    return %c0_i32, %c0_i32_0 : i32, i32
  }
  func.func @transform_4(%arg0: i32, %arg1: i32) -> (i32, i32) {
    %c0_i32 = arith.constant 0 : i32
    %c0_i32_0 = arith.constant 0 : i32
    %c0_i32_1 = arith.constant 0 : i32
    return %c0_i32, %c0_i32_0 : i32, i32
  }
  func.func @transform_5(%arg0: i32, %arg1: i32) -> (i32, i32, i32) {
    %c0_i32 = arith.constant 0 : i32
    %c0_i32_0 = arith.constant 0 : i32
    %c0_i32_1 = arith.constant 0 : i32
    return %arg0, %c0_i32, %c0_i32_0 : i32, i32, i32
  }
}

</mosaic_0001>

<bundles_post_ra>
// kernel: tpu_custom_call.1
= control target key start
LH: loop header
LB: loop body
LE: loop exit
PB: predicated region body
PF: predicated region fallthrough
CT: control target
= control target key end

     0   :  { %10 = vsyncpa [#allocation4], 0  ;;  %s1495_s0 = inlined_call_operand.hbm [shape: f32[2,16,32], index: 0, kind: input, shape index: {}]   ;;  %s1496_s1 = inlined_call_operand.hbm [shape: f32[32,32], index: 1, kind: input, shape index: {}]   ;;  %s1497_s2 = inlined_call_operand.hbm [shape: f32[32,32], index: 2, kind: input, shape index: {}]   ;;  %s1498_s3 = inlined_call_operand.hbm [shape: f32[32,64], index: 3, kind: input, shape index: {}]   ;;  %s1499_s4 = inlined_call_operand.vmem [shape: f32[1,64], index: 4, kind: input, shape index: {}]   ;;  %s1500_s5 = inlined_call_operand.hbm [shape: f32[2,32,64], index: 5, kind: output, shape index: {}]  }
   0x1   :  { %12 = vsyncpa [#allocation4 + $0x1], 0 }
   0x2   :  { %13 = vsyncpa [#allocation7], 0 }
   0x3   :  { %14 = vsyncpa [#allocation10], 0 }
   0x4   :  { %15 = vsyncpa [#allocation5], 0 }
   0x5   :  { %17 = vsyncpa [#allocation5 + $0x1], 0  ;;  %s1155_s18 = smov 0   ;;  %s1157_s19 = smov 0  }
   0x6   :  { %s1159_s20 = smov 0   ;;  %s1161_s21 = smov 0  }
   0x7   :  { %s1163_s22 = smov 0   ;;  %s1165_s23 = smov 0  }
   0x8 LB: > { %1507 = sst [smem:[#allocation16_spill]] %s1093_s18  ;;  %s732_s24 = sadd.s32 4294967295, %s1113_s23   ;;  %s1113_s23 = sphi %s1165_s23, %s23_s23   ;;  %s1109_s22 = sphi %s1163_s22, %s1530_s22   ;;  %s1105_s21 = sphi %s1161_s21, %s1529_s21   ;;  %s1101_s20 = sphi %s1159_s20, %s1528_s20   ;;  %s1097_s19 = sphi %s1157_s19, %s1527_s19   ;;  %s1093_s18 = sphi %s1155_s18, %s1526_s18  }
   0x9   : > { %s733_s25 = sadd.s32 4294967294, %s1113_s23   ;;  %p57_p0 = scmp.ne.s32.totalorder %s1097_s19, %s1093_s18 }
   0xa   : > { %p1189_p1 = scmp.eq.s32.totalorder %s732_s24, 0  ;;  %p1193_p2 = scmp.eq.s32.totalorder %s732_s24, 1 }
   0xb   : > { %p171_p3 = scmp.eq.s32.totalorder %s733_s25, 1  ;;  %p734_p5 = scmp.ge.s32.totalorder %s1113_s23, 1 }
   0xc   : > { %s1508_s26 = scalar_select %p1189_p1, 1, 0 }
   0xd   : > { %s1509_s27 = scalar_select %p1193_p2, 1, 0 }
   0xe   : > { %p1199_p4 = por %p1189_p1, %p57_p0  ;;  %p1204_p6 = por %p171_p3, %p57_p0 }
   0xf   : > { %p178_p7 = scmp.lt.s32.totalorder %s1113_s23, 3  ;;  %s1115_s6 = smov [#allocation6]  }
  0x10   : > { %s1510_s28 = scalar_select %p1199_p4, 1, 0 }
  0x11   : > { %s1511_s29 = scalar_select %p1204_p6, 1, 0 }
  0x12   : > { %p1209_p8 = pnand %p734_p5, %p178_p7  ;;  %s190_s7 = sshll.u32 %s1115_s6, 4  ;;  %s1213_s7 = int_to_ptr.vmem [resolvable:$true] %s190_s7 }
  0x13   : > { %1512 = sst [smem:[#allocation17_spill]] %s1511_s29  ;;  %s1116_s9 = smov [#allocation8]  }
  0x14   : > { %s1513_s30 = scalar_select %p1209_p8, 1, 0 }
  0x15   : > { %p811_p9 = pneg %p1209_p8  ;;  %s203_s10 = sshll.u32 %s1116_s9, 4  ;;  %s1224_s10 = int_to_ptr.vmem [resolvable:$true] %s203_s10 }
  0x16   : > { %s1117_s11 = smov [#allocation9]   ;;  %s909_s15 = scalar_lea.hbm %s1496_s1, 512 }
  0x17   : > { %p1220_p11 = pnand %p811_p9, %p1189_p1  ;;  %s1226_s12 = sshll.u32 %s1117_s11, 4  ;;  %s217_s12 = int_to_ptr.vmem [resolvable:$true] %s1226_s12 }
  0x18   : > { %p910_p12 = scmp.ne.s32.totalorder %s1496_s1, %s909_s15  ;;  %p916_p5 = scmp.lt.u32.totalorder %s909_s15, %s1496_s1 }
  0x19   : > { %p1236_p13 = pneg %p1220_p11 }
  0x1b   : > { %p912_p0 = pnand %p1236_p13, %p910_p12 }
  0x1d   : > { %p913_p3 = pneg %p912_p0 }
  0x1f   : > { %p918_p7 = pnand %p916_p5, %p913_p3 }
  0x21   : > { %921 = shalt.err (!%p918_p7)
}
  0x22   : > { %s922_s9 = scalar_lea.vmem %s1213_s7, 512  ;;  %p930_p1 = scmp.lt.s32.totalorder %s1213_s7, %s1213_s7 }
  0x23   : > { %p923_p9 = scmp.ne.s32.totalorder %s1213_s7, %s922_s9  ;;  %p931_p4 = scmp.lt.s32.totalorder %s922_s9, %s922_s9 }
  0x25   : > { %p925_p10 = pnand %p923_p9, %p1236_p13  ;;  %p932_p12 = por %p931_p4, %p930_p1 }
  0x27   : > { %p926_p6 = pneg %p925_p10 }
  0x29   : > { %p933_p0 = pnand %p932_p12, %p926_p6 }
  0x2b   : > { %936 = shalt.err (!%p933_p0)
}
  0x2c   : > { %s1118_s11 = smov 128   ;;  %s1119_s13 = smov 8  }
  0x2d   : > { %814 = dma.hbm_to_vmem [thread:$0]  (!%p1220_p11), %s1496_s1, 512, %s1213_s7, [#allocation7], %s1118_s11, %s1118_s11, %s1119_s13  }
  0x2e   : > { %s937_s25 = scalar_lea.hbm %s1497_s2, 512 }
  0x2f   : > { %p938_p1 = scmp.ne.s32.totalorder %s1497_s2, %s937_s25  ;;  %p944_p10 = scmp.lt.u32.totalorder %s937_s25, %s1497_s2 }
  0x31   : > { %p940_p4 = pnand %p938_p1, %p1236_p13 }
  0x33   : > { %p941_p6 = pneg %p940_p4 }
  0x35   : > { %p946_p3 = pnand %p944_p10, %p941_p6 }
  0x37   : > { %949 = shalt.err (!%p946_p3)
}
  0x38   : > { %s950_s7 = scalar_lea.vmem %s1224_s10, 512  ;;  %p958_p12 = scmp.lt.s32.totalorder %s1224_s10, %s1224_s10 }
  0x39   : > { %p951_p5 = scmp.ne.s32.totalorder %s1224_s10, %s950_s7  ;;  %p959_p0 = scmp.lt.s32.totalorder %s950_s7, %s950_s7 }
  0x3b   : > { %p953_p7 = pnand %p951_p5, %p1236_p13  ;;  %p960_p1 = por %p959_p0, %p958_p12 }
  0x3d   : > { %p954_p9 = pneg %p953_p7 }
  0x3f   : > { %p961_p4 = pnand %p960_p1, %p954_p9 }
  0x41   : > { %964 = shalt.err (!%p961_p4)
}
  0x42   : > { %817 = dma.hbm_to_vmem [thread:$0]  (!%p1220_p11), %s1497_s2, 512, %s1224_s10, [#allocation7], %s1118_s11, %s1118_s11, %s1119_s13  }
  0x43   : > { %s965_s16 = scalar_lea.hbm %s1498_s3, 512 }
  0x44   : > { %p966_p6 = scmp.ne.s32.totalorder %s1498_s3, %s965_s16  ;;  %p972_p5 = scmp.lt.u32.totalorder %s965_s16, %s1498_s3 }
  0x46   : > { %p968_p10 = pnand %p966_p6, %p1236_p13 }
  0x48   : > { %p969_p3 = pneg %p968_p10 }
  0x4a   : > { %p974_p7 = pnand %p972_p5, %p969_p3 }
  0x4c   : > { %977 = shalt.err (!%p974_p7)
}
  0x4d   : > { %s978_s7 = scalar_lea.vmem %s217_s12, 512  ;;  %p986_p1 = scmp.lt.s32.totalorder %s217_s12, %s217_s12 }
  0x4e   : > { %p979_p9 = scmp.ne.s32.totalorder %s217_s12, %s978_s7  ;;  %p987_p4 = scmp.lt.s32.totalorder %s978_s7, %s978_s7 }
  0x50   : > { %p981_p12 = pnand %p979_p9, %p1236_p13  ;;  %p988_p8 = por %p987_p4, %p986_p1 }
  0x52   : > { %p982_p0 = pneg %p981_p12 }
  0x54   : > { %p989_p2 = pnand %p988_p8, %p982_p0 }
  0x56   : > { %992 = shalt.err (!%p989_p2)
}
  0x57   : > { %820 = dma.hbm_to_vmem [thread:$0]  (!%p1220_p11), %s1498_s3, 512, %s217_s12, [#allocation10], %s1118_s11, %s1118_s11, %s1119_s13  }
  0x58   : > { %s44_s24 = sadd.s32 1, %s1101_s20  ;;  %s35_s8 = sadd.s32 1, %s1109_s22 }
  0x59   : > { %p51_p2 = scmp.ne.s32.totalorder %s1101_s20, %s1097_s19  ;;  %p37_p8 = scmp.ge.s32.totalorder %s35_s8, 2 }
  0x5a   : > { %p52_p13 = scmp.eq.s32.totalorder %s1113_s23, 0  ;;  %p1516_p6 = scmp.ne.s32.totalorder %s1509_s27, 0 }
  0x5b   : > { %p832_p3 = scmp.lt.s32.totalorder %s1113_s23, 2  ;;  %s1532_s8 = smov (%p37_p8, %s35_s8), 0 }
  0x5c   : > { %p1315_p10 = por %p1516_p6, %p51_p2  ;;  %p53_p5 = por %p52_p13, %p51_p2 }
  0x5d   : > { %s233_s14 = sand.u32 1, %s1101_s20   ;;  %s39_s15 = ssub.s32 %s1109_s22, %s1532_s8 }
  0x5e   : > { %p42_p7 = scmp.eq.s32.totalorder %s39_s15, 0  ;;  %s739_s12 = sshll.u32 %s233_s14, 4 }
  0x5f   : > { %s759_s16 = sshll.u32 %s1109_s22, 8  ;;  %s237_s9 = scalar_lea.vmem [#allocation3], %s739_s12 }
  0x60   : > { %s1327_s17 = scalar_select %p42_p7, %s1101_s20, %s44_s24  }
  0x61   : > { %s1332_s27 = scalar_lea.hbm %s1495_s0, %s759_s16  ;;  %s246_s7 = sshll.u32 %s237_s9, 4  ;;  %s1334_s7 = int_to_ptr.vmem [resolvable:$true] %s246_s7 }
  0x62   : > { %p1338_p11 = pnand %p832_p3, %p53_p5  ;;  %s1342_s18 = scalar_lea.sflag [#allocation4], %s233_s14 }
  0x63   : > { %s993_s24 = scalar_lea.hbm %s1332_s27, 256  ;;  %s998_s16 = scalar_lea.hbm %s1495_s0, 512 }
  0x64   : > { %p994_p9 = scmp.ne.s32.totalorder %s1332_s27, %s993_s24  ;;  %p995_p12 = pneg %p1338_p11 }
  0x65   : > { %p999_p4 = scmp.lt.u32.totalorder %s1332_s27, %s1495_s0  ;;  %p1000_p2 = scmp.lt.u32.totalorder %s998_s16, %s993_s24 }
  0x66   : > { %p996_p0 = pnand %p995_p12, %p994_p9  ;;  %p1002_p13 = scmp.lt.u32.totalorder %s993_s24, %s1332_s27 }
  0x67   : > { %p1001_p8 = por %p1000_p2, %p999_p4 }
  0x68   : > { %p997_p1 = pneg %p996_p0 }
  0x69   : > { %p1003_p6 = por %p1002_p13, %p1001_p8 }
  0x6b   : > { %p1004_p3 = pnand %p1003_p6, %p997_p1 }
  0x6d   : > { %1007 = shalt.err (!%p1004_p3)
}
  0x6e   : > { %s1008_s14 = scalar_lea.vmem %s1334_s7, 256  ;;  %s1120_s9 = smov [#allocation3]  }
  0x6f   : > { %p1009_p5 = scmp.ne.s32.totalorder %s1334_s7, %s1008_s14  ;;  %s1013_s15 = sshll.u32 %s1120_s9, 4  ;;  %s1014_s15 = int_to_ptr.vmem [resolvable:$false] %s1013_s15 }
  0x70   : > { %s1015_s12 = scalar_lea.vmem %s1014_s15, 512  ;;  %p1016_p0 = scmp.lt.s32.totalorder %s1334_s7, %s1014_s15 }
  0x71   : > { %p1011_p7 = pnand %p1009_p5, %p995_p12  ;;  %p1017_p4 = scmp.lt.s32.totalorder %s1015_s12, %s1008_s14 }
  0x73   : > { %p1012_p9 = pneg %p1011_p7  ;;  %p1018_p2 = por %p1017_p4, %p1016_p0 }
  0x75   : > { %p1019_p8 = pnand %p1018_p2, %p1012_p9 }
  0x77   : > { %1022 = shalt.err (!%p1019_p8)
}
  0x78   : > { %824 = dma.hbm_to_vmem [thread:$0]  (!%p1338_p11), %s1332_s27, 256, %s1334_s7, %s1342_s18, %s1118_s11, %s1118_s11, %s1119_s13  }
  0x79   : > { %p1519_p12 = scmp.ne.s32.totalorder %s1513_s30, 0 }
  0x7a   : > { %s1376_s24 = sand.u32 (!%p1519_p12), 1, %s1097_s19   ;;  %p1520_p1 = scmp.ne.s32.totalorder (!%p1519_p12), %s1510_s28, 0 }
  0x7b   : > { %258 = sbr.rel (%p1519_p12) target bundleno = 586 (0x24a), region = 40  ;;  %s743_s16 = sshll.u32 (!%p1519_p12), %s1376_s24, 4 }
  0x7c   : > { %s261_s25 = scalar_lea.sflag (!%p1519_p12), [#allocation4], %s1376_s24  ;;  %s264_s6 = scalar_lea.vmem (!%p1519_p12), [#allocation3], %s743_s16 }
  0x82   : > { %1076 = dma.done.wait (%p1520_p1), %s261_s25, 256  }
  0x83   : > { %1078 = vsyncadd (%p1520_p1), %s261_s25, 4294967040  ;;  %p1521_p13 = scmp.ne.s32.totalorder %s1508_s26, 0 }
  0x85   : > { %1080 = dma.done.wait (%p1521_p13), [#allocation7], 1024  }
  0x86   : > { %1082 = vsyncadd (%p1521_p13), [#allocation7], 4294966272 }
  0x87   : > { %1084 = dma.done.wait (%p1521_p13), [#allocation10], 512  }
  0x88   : > { %1086 = vsyncadd (%p1521_p13), [#allocation10], 4294966784  ;;  %vm308_vm0 = vcmask 253952   ;;  %v1121_v0 = vmov 0.0   ;;  %vm313_vm1 = vcmask 261120   ;;  %v311_v1 = vld [vmem:[%s264_s6] sm:$0xff] }
  0x89   : > { %309 = vst.msk [vmem:[#allocation2] sm:$0x1] %vm308_vm0, %v1121_v0  ;;  %v312_v2 = vld [vmem:[%s264_s6 + $0x8] sm:$0xff]  ;;  %v314_v3 = vsel %vm313_vm1, %v311_v1, 0.0  ;;  %v460_v6 = vld [vmem:[#allocation9] sm:$0xff]  ;;  %v332_v19 = vld [vmem:[#allocation6 + $0x10] sm:$0xff] }
  0x8a   : > { %v315_v4 = vsel %vm313_vm1, %v312_v2, 0.0  ;;  %v461_v8 = vld [vmem:[#allocation9 + $0x8] sm:$0xff]  ;;  %v330_v17 = vld [vmem:[#allocation6] sm:$0xff]  ;;  %v333_v20 = vld [vmem:[#allocation6 + $0x18] sm:$0xff]  ;;  %s747_s26 = sshll.u32 %s1376_s24, 5  ;;  %vm600_vm6 = vcmask 523264  }
  0x8b   : > { %v316_v5 = vadd.f32 %v315_v4, %v314_v3  ;;  %v783_v9 = vpack.c.bf16 %v461_v8, %v460_v6  ;;  %v331_v18 = vld [vmem:[#allocation6 + $0x8] sm:$0xff]  ;;  %v344_v21 = vld [vmem:[#allocation8] sm:$0xff]  ;;  %v346_v24 = vld [vmem:[#allocation8 + $0x10] sm:$0xff]  ;;  %s302_s11 = scalar_lea.vmem [#allocation11], %s747_s26  ;;  %s760_s27 = sshll.u32 %s1105_s21, 9 }
  0x8c   : > { %v345_v22 = vld [vmem:[#allocation8 + $0x8] sm:$0xff]  ;;  %v347_v25 = vld [vmem:[#allocation8 + $0x18] sm:$0xff]  ;;  %s619_s13 = sshll.u32 %s302_s11, 4  ;;  %s1444_s18 = scalar_lea.hbm %s1500_s5, %s760_s27  ;;  %s1439_s13 = int_to_ptr.vmem [resolvable:$true] %s619_s13 }
  0x8d   : > { %v317_v7 = vrot.slane %v316_v5, 4  ;;  %784 = vmatprep.subr.bf16.mxu0 %v783_v9  ;;  %791 = vmatprep.subr.bf16.mxu1 %v783_v9  ;;  %s606_s14 = scalar_lea.sflag [#allocation5], %s1376_s24  ;;  %s1023_s21 = scalar_lea.vmem %s1439_s13, 512 }
  0x8e   : > { %786 = vmatpush3.bf16.msra.mxu0 %v783_v9  ;;  %793 = vmatpush3.bf16.msra.mxu1 %v783_v9  ;;  %p1024_p11 = scmp.ne.s32.totalorder %s1439_s13, %s1023_s21  ;;  %s1122_s9 = smov [#allocation11]  }
  0x8f   : > { %v318_v10 = vadd.f32 %v317_v7, %v316_v5  ;;  %s1027_s15 = sshll.u32 %s1122_s9, 4  ;;  %s1028_s15 = int_to_ptr.vmem [resolvable:$false] %s1027_s15 }
  0x90   : > { %v310_v14 = vld [vmem:[#allocation2] sm:$0x1]  ;;  %p1025_p6 = pnand %p1024_p11, %p1315_p10  ;;  %s1029_s12 = scalar_lea.vmem %s1028_s15, 1024 }
  0x91   : > { %v319_v11 = vrot.slane %v318_v10, 2  ;;  %p1030_p5 = scmp.lt.s32.totalorder %s1439_s13, %s1028_s15  ;;  %p1031_p7 = scmp.lt.s32.totalorder %s1029_s12, %s1023_s21 }
  0x92   : > { %p1026_p3 = pneg %p1025_p6 }
  0x93   : > { %v320_v12 = vadd.f32 %v319_v11, %v318_v10  ;;  %p1032_p9 = por %p1031_p7, %p1030_p5 }
  0x95   : > { %v321_v13 = vrot.slane %v320_v12, 1  ;;  %p1033_p0 = pnand %p1032_p9, %p1026_p3 }
  0x97   : > { %v322_v15 = vadd.f32 %v321_v13, %v320_v12 }
  0x99   : > { %v323_v16 = vadd.f32 %v322_v15, %v310_v14 }
  0x9b   : > { %325 = vst.msk [vmem:[#allocation2] sm:$0x1] %vm308_vm0, %v323_v16 }
  0xa2   : > { %v748_v23 = vld [vmem:[#allocation2] ss:$0 sm:$0xff] }
  0xa3   : > { %v340_v26 = vmul.f32 %v748_v23, %v330_v17  ;;  %v341_v27 = vmul.f32 %v748_v23, %v331_v18  ;;  %v342_v28 = vmul.f32 %v748_v23, %v332_v19  ;;  %v343_v29 = vmul.f32 %v748_v23, %v333_v20 }
  0xa5   : > { %v1396_v30 = vadd.f32 %v344_v21, %v340_v26  ;;  %v1398_v31 = vadd.f32 %v345_v22, %v341_v27  ;;  %v1400_v32 = vadd.f32 %v346_v24, %v342_v28  ;;  %v1402_v33 = vadd.f32 %v347_v25, %v343_v29 }
  0xa7   : > { %v1405_v34 = vmul.f32 0.70710677, %v1396_v30  ;;  %v1408_v35 = vmul.f32 0.70710677, %v1398_v31  ;;  %v1411_v36 = vmul.f32 0.70710677, %v1400_v32 }
  0xa8   : > { %v1414_v37 = vmul.f32 0.70710677, %v1402_v33 }
  0xa9   : > { %v360_v38 = vand.u32 2147483647, %v1405_v34  ;;  %v361_v39 = vand.u32 2147483647, %v1408_v35  ;;  %v362_v40 = vand.u32 2147483647, %v1411_v36 }
  0xaa   : > { %v363_v41 = vand.u32 2147483647, %v1414_v37  ;;  %vm440_vm2 = vcmp.ge.f32.partialorder %v1405_v34, 0.0  ;;  %vm441_vm3 = vcmp.ge.f32.partialorder %v1408_v35, 0.0  ;;  %vm442_vm4 = vcmp.ge.f32.partialorder %v1411_v36, 0.0  ;;  %v462_v35 = vld [vmem:[#allocation9 + $0x10] sm:$0xff] }
  0xab   : > { %v364_v42 = vmul.f32 0.3275911, %v360_v38  ;;  %v365_v43 = vmul.f32 0.3275911, %v361_v39  ;;  %v366_v44 = vmul.f32 0.3275911, %v362_v40 }
  0xac   : > { %v367_v47 = vmul.f32 0.3275911, %v363_v41  ;;  %v416_v50 = vsub.f32 0.0, %v360_v38  ;;  %v417_v51 = vsub.f32 0.0, %v361_v39  ;;  %v418_v53 = vsub.f32 0.0, %v362_v40 }
  0xad   : > { %v368_v45 = vadd.f32 1.0, %v364_v42  ;;  %v369_v46 = vadd.f32 1.0, %v365_v43  ;;  %v370_v48 = vadd.f32 1.0, %v366_v44  ;;  %v419_v56 = vsub.f32 0.0, %v363_v41 }
  0xae   : > { %v371_v49 = vadd.f32 1.0, %v367_v47  ;;  %v420_v52 = vmul.f32 %v416_v50, %v360_v38  ;;  %v421_v54 = vmul.f32 %v417_v51, %v361_v39  ;;  %v422_v61 = vmul.f32 %v418_v53, %v362_v40 }
  0xaf   : > { %893 = vrcp.f32 %v368_v45  ;;  %v423_v2 = vmul.f32 %v419_v56, %v363_v41  ;;  %v352_v56 = vmul.f32 0.5, %v1396_v30  ;;  %vm443_vm5 = vcmp.ge.f32.partialorder %v1414_v37, 0.0 }
  0xb0   : > { %895 = vrcp.f32 %v369_v46  ;;  %v424_v59 = vmul.f32 1.442695, %v420_v52  ;;  %v426_v63 = vmul.f32 1.442695, %v421_v54  ;;  %v428_v7 = vmul.f32 1.442695, %v422_v61 }
  0xb1   : > { %897 = vrcp.f32 %v370_v48  ;;  %v430_v12 = vmul.f32 1.442695, %v423_v2  ;;  %v355_v37 = vmul.f32 0.5, %v1402_v33  ;;  %v749_v33 = vld [vmem:[%s1499_s4] ss:$0 sm:$0xff] }
  0xb2   : > { %899 = vrcp.f32 %v371_v49 }
  0xb3   : > { %901 = vpow2.f32 %v424_v59 }
  0xb4   : > { %903 = vpow2.f32 %v426_v63 }
  0xb5   : > { %905 = vpow2.f32 %v428_v7  ;;  %v354_v7 = vmul.f32 0.5, %v1400_v32 }
  0xb6   : > { %907 = vpow2.f32 %v430_v12 }
  0xb9   : > { %v894_v55 = vpop.eup %893 }
  0xba   : > { %v896_v57 = vpop.eup %895  ;;  %v380_v58 = vmul.f32 1.0614054, %v894_v55 }
  0xbb   : > { %v381_v60 = vmul.f32 1.0614054, %v896_v57  ;;  %v898_v0 = vpop.eup %897 }
  0xbc   : > { %v384_v62 = vadd.f32 -1.4531521, %v380_v58  ;;  %v382_v4 = vmul.f32 1.0614054, %v898_v0  ;;  %v900_v5 = vpop.eup %899 }
  0xbd   : > { %v385_v1 = vadd.f32 -1.4531521, %v381_v60  ;;  %v383_v10 = vmul.f32 1.0614054, %v900_v5  ;;  %v902_v28 = vpop.eup %901 }
  0xbe   : > { %v388_v3 = vmul.f32 %v894_v55, %v384_v62  ;;  %v386_v9 = vadd.f32 -1.4531521, %v382_v4  ;;  %v904_v38 = vpop.eup %903  ;;  %v353_v62 = vmul.f32 0.5, %v1398_v31 }
  0xbf   : > { %v389_v6 = vmul.f32 %v896_v57, %v385_v1  ;;  %v387_v15 = vadd.f32 -1.4531521, %v383_v10  ;;  %v906_v46 = vpop.eup %905 }
  0xc0   : > { %v392_v8 = vadd.f32 1.4214138, %v388_v3  ;;  %v390_v14 = vmul.f32 %v898_v0, %v386_v9  ;;  %v908_v51 = vpop.eup %907  ;;  %v463_v3 = vld [vmem:[#allocation9 + $0x18] sm:$0xff] }
  0xc1   : > { %v393_v11 = vadd.f32 1.4214138, %v389_v6  ;;  %v391_v19 = vmul.f32 %v900_v5, %v387_v15 }
  0xc2   : > { %v396_v13 = vmul.f32 %v894_v55, %v392_v8  ;;  %v394_v18 = vadd.f32 1.4214138, %v390_v14 }
  0xc3   : > { %v397_v16 = vmul.f32 %v896_v57, %v393_v11  ;;  %v395_v23 = vadd.f32 1.4214138, %v391_v19 }
  0xc4   : > { %v400_v17 = vadd.f32 -0.28449672, %v396_v13  ;;  %v398_v22 = vmul.f32 %v898_v0, %v394_v18 }
  0xc5   : > { %v401_v20 = vadd.f32 -0.28449672, %v397_v16  ;;  %v399_v27 = vmul.f32 %v900_v5, %v395_v23 }
  0xc6   : > { %v404_v21 = vmul.f32 %v894_v55, %v400_v17  ;;  %v402_v26 = vadd.f32 -0.28449672, %v398_v22 }
  0xc7   : > { %v405_v24 = vmul.f32 %v896_v57, %v401_v20  ;;  %v403_v41 = vadd.f32 -0.28449672, %v399_v27 }
  0xc8   : > { %v408_v25 = vadd.f32 0.2548296, %v404_v21  ;;  %v406_v40 = vmul.f32 %v898_v0, %v402_v26 }
  0xc9   : > { %v409_v29 = vadd.f32 0.2548296, %v405_v24  ;;  %v407_v45 = vmul.f32 %v900_v5, %v403_v41 }
  0xca   : > { %v412_v39 = vmul.f32 %v894_v55, %v408_v25  ;;  %v410_v44 = vadd.f32 0.2548296, %v406_v40 }
  0xcb   : > { %v413_v42 = vmul.f32 %v896_v57, %v409_v29  ;;  %v411_v50 = vadd.f32 0.2548296, %v407_v45 }
  0xcc   : > { %v432_v43 = vmul.f32 %v902_v28, %v412_v39  ;;  %v414_v49 = vmul.f32 %v898_v0, %v410_v44 }
  0xcd   : > { %v433_v47 = vmul.f32 %v904_v38, %v413_v42  ;;  %v415_v55 = vmul.f32 %v900_v5, %v411_v50  ;;  %v787_v5 = vpack.c.bf16 %v463_v3, %v462_v35 }
  0xce   : > { %v436_v48 = vsub.f32 1.0, %v432_v43  ;;  %v434_v54 = vmul.f32 %v906_v46, %v414_v49 }
  0xcf   : > { %v437_v52 = vsub.f32 1.0, %v433_v47  ;;  %v435_v60 = vmul.f32 %v908_v51, %v415_v55  ;;  %788 = vmatprep.subr.bf16.mxu0 %v787_v5  ;;  %792 = vmatprep.subr.bf16.mxu1 %v787_v5 }
  0xd0   : > { %v444_v53 = vsub.f32 0.0, %v436_v48  ;;  %v438_v59 = vsub.f32 1.0, %v434_v54  ;;  %790 = vmatpush3.bf16.msra.mxu0 %v787_v5  ;;  %794 = vmatpush3.bf16.msra.mxu1 %v787_v5 }
  0xd1   : > { %v445_v57 = vsub.f32 0.0, %v437_v52  ;;  %v439_v1 = vsub.f32 1.0, %v435_v60 }
  0xd2   : > { %v448_v58 = vsel %vm440_vm2, %v436_v48, %v444_v53  ;;  %v446_v34 = vsub.f32 0.0, %v438_v59 }
  0xd3   : > { %v452_v61 = vadd.f32 1.0, %v448_v58  ;;  %v449_v63 = vsel %vm441_vm3, %v437_v52, %v445_v57  ;;  %v447_v30 = vsub.f32 0.0, %v439_v1 }
  0xd4   : > { %v453_v0 = vadd.f32 1.0, %v449_v63  ;;  %v450_v4 = vsel %vm442_vm4, %v438_v59, %v446_v34 }
  0xd5   : > { %v456_v2 = vmul.f32 %v452_v61, %v352_v56  ;;  %v454_v8 = vadd.f32 1.0, %v450_v4  ;;  %v451_v31 = vsel %vm443_vm5, %v439_v1, %v447_v30 }
  0xd6   : > { %v457_v6 = vmul.f32 %v453_v0, %v353_v62  ;;  %v455_v9 = vadd.f32 1.0, %v451_v31 }
  0xd7   : > { %471 = vxpose.xlu0.b32.start [1/4] (short) (narrow) %v456_v2, 32  ;;  %v458_v36 = vmul.f32 %v454_v8, %v354_v7 }
  0xd8   : > { %v459_v10 = vmul.f32 %v455_v9, %v355_v37 }
  0xdb   : > { %472 = vxpose.xlu0.b32.cont [2/4] (short) (narrow) %v457_v6, 32 }
  0xdf   : > { %473 = vxpose.xlu0.b32.cont [3/4] (short) (narrow) %v458_v36, 32 }
  0xe3   : > { %474 = vxpose.xlu0.b32.end [4/4] (short) (narrow) %v459_v10, 32 }
 0x157   : > { %v487_v11 = vpop.trf.xlu0 }
 0x158   : > { %777 = vmatprep.mubr.msk.f32.mxu0 %vm313_vm1, %v487_v11 }
 0x15b   : > { %v488_v12 = vpop.trf.xlu0 }
 0x15c   : > { %778 = vmatmul.mubr.msk.f32.vlgmr.msra.gmra.mrb[0].mxu0 %vm313_vm1, %v488_v12 }
 0x15f   : > { %v489_v32 = vpop.trf.xlu0 }
 0x160   : > { %780 = vmatprep.mubr.msk.f32.mxu1 %vm313_vm1, %v489_v32 }
 0x163   : > { %v490_v13 = vpop.trf.xlu0 }
 0x164   : > { %781 = vmatmul.mubr.msk.f32.vlgmr.msra.gmra.mrb[0].mxu1 %vm313_vm1, %v490_v13 }
 0x22f   : > { %v779_v14 = vpop.f32.mrb[0].mxu0 }
 0x230   : > { %v587_v15 = vadd.f32 %v779_v14, %v749_v33  ;;  %v581_v16 = vpop.f32.mrb[1].mxu0 }
 0x231   : > { %v582_v17 = vadd.f32 %v749_v33, %v581_v16 }
 0x232   : > { %602 = vst.msk [vmem:[%s302_s11 + $0x8] sm:$0xff] %vm600_vm6, %v587_v15 }
 0x233   : > { %601 = vst.msk [vmem:[%s302_s11] sm:$0xff] %vm600_vm6, %v582_v17 }
 0x237   : > { %v782_v18 = vpop.f32.mrb[0].mxu1 }
 0x238   : > { %v597_v19 = vadd.f32 %v782_v18, %v749_v33  ;;  %v591_v20 = vpop.f32.mrb[1].mxu1 }
 0x239   : > { %v592_v21 = vadd.f32 %v749_v33, %v591_v20 }
 0x23a   : > { %604 = vst.msk [vmem:[%s302_s11 + $0x18] sm:$0xff] %vm600_vm6, %v597_v19 }
 0x23b   : > { %603 = vst.msk [vmem:[%s302_s11 + $0x10] sm:$0xff] %vm600_vm6, %v592_v21 }
 0x23c   : > { %1036 = shalt.err (!%p1033_p0)
}
 0x23d   : > { %s1037_s16 = scalar_lea.hbm %s1444_s18, 512  ;;  %s1041_s26 = scalar_lea.hbm %s1500_s5, 1024 }
 0x23e   : > { %p1038_p4 = scmp.ne.s32.totalorder %s1444_s18, %s1037_s16  ;;  %p1042_p12 = scmp.lt.u32.totalorder %s1444_s18, %s1500_s5 }
 0x23f   : > { %p1043_p1 = scmp.lt.u32.totalorder %s1041_s26, %s1037_s16  ;;  %p1045_p11 = scmp.lt.u32.totalorder %s1037_s16, %s1444_s18 }
 0x240   : > { %p1039_p2 = pnand %p1038_p4, %p1315_p10 }
 0x241   : > { %p1044_p13 = por %p1043_p1, %p1042_p12 }
 0x242   : > { %p1040_p8 = pneg %p1039_p2 }
 0x243   : > { %p1046_p6 = por %p1045_p11, %p1044_p13 }
 0x245   : > { %p1047_p3 = pnand %p1046_p6, %p1040_p8 }
 0x247   : > { %1050 = shalt.err (!%p1047_p3)
}
 0x248   : > { %s1123_s11 = smov 128   ;;  %s1124_s27 = smov 8  }
 0x249   : > { %809 = dma.vmem_to_hbm [thread:$0]  (%p1315_p10), %s1439_s13, 512, %s1444_s18, %s606_s14, %s1123_s11, %s1123_s11, %s1124_s27  }
 0x24a PF: > { %s1522_s7 = sld [smem:[#allocation16_spill]]  ;;  %s1523_s10 = sld [smem:[#allocation17_spill]] }
 0x24b   : > { %p1525_p7 = scmp.ge.s32.totalorder %s1113_s23, 2 }
 0x250   : > { %s634_s21 = sand.u32 1, %s1522_s7   ;;  %p1524_p5 = scmp.ne.s32.totalorder %s1523_s10, 0 }
 0x251   : > { %s635_s9 = scalar_lea.sflag [#allocation5], %s634_s21 }
 0x252   : > { %p826_p9 = pnand %p1525_p7, %p1524_p5 }
 0x254   : > { %1088 = dma.done.wait (!%p826_p9), %s635_s9, 512  }
 0x255   : > { %1090 = vsyncadd (!%p826_p9), %s635_s9, 4294966784  ;;  %s23_s23 = sadd.s32 1, %s1113_s23   ;;  %s1526_s18 = smov %s1097_s19 }
 0x256   : > { %p20_p0 = scmp.ge.s32.totalorder %s23_s23, 4   ;;  %s1527_s19 = smov %s1101_s20 }
 0x257   : > { %s1528_s20 = smov %s1327_s17  ;;  %s1529_s21 = smov %s1109_s22 }
 0x258   : > { %s1530_s22 = smov %s1532_s8  ;;  %22 = sbr.rel (!%p20_p0) target bundleno = 8 (0x8), region = 105 }
 0x25f   :  { %640 = vsyncpa [#allocation4], 1 }
 0x260   :  { %642 = vsyncpa [#allocation4 + $0x1], 1 }
 0x261   :  { %643 = vsyncpa [#allocation7], 1 }
 0x262   :  { %644 = vsyncpa [#allocation10], 1 }
 0x263   :  { %645 = vsyncpa [#allocation5], 1 }
 0x264   :  { %647 = vsyncpa [#allocation5 + $0x1], 1 }

</bundles_post_ra>
